<compile_context>
chip_gen: v7x
topology: tpu7x:2x2x1
jax: 0.10.0
libtpu: 0.0.40
codegen_flags: <defaults>
</compile_context>

<pallas_src>
import functools
import math

import jax
import jax.numpy as jnp
from jax.experimental import pallas as pl
from jax.experimental.pallas import tpu as pltpu


def _round_up(x, m):
    return (x + m - 1) // m * m


# ----------------------------------------------------------------------------
# Pallas kernel: tiled matmul + bias + optional ReLU with K-reduction grid.
# ----------------------------------------------------------------------------
def _matmul_bias_act_kernel(x_ref, w_ref, b_ref, o_ref, acc_ref, *, apply_relu):
    k = pl.program_id(2)

    @pl.when(k == 0)
    def _():
        acc_ref[...] = jnp.zeros_like(acc_ref)

    acc_ref[...] += jnp.dot(x_ref[...], w_ref[...],
                            preferred_element_type=jnp.float32)

    @pl.when(k == pl.num_programs(2) - 1)
    def _():
        out = acc_ref[...] + b_ref[...]          # bias only once, on last K step
        if apply_relu:
            out = jnp.maximum(out, 0.0)
        o_ref[...] = out.astype(o_ref.dtype)


def matmul_bias_act(x, w, b, *, relu, tm=256, tn=256, tk=512):
    """y = relu?(x @ w + b).  x:(M,K), w:(K,N), b:(N,) -> (M,N) f32.

    Operands are zero-padded to lane/sublane-aligned tile multiples and cast to
    bf16 for the MXU; accumulation is f32 in a VMEM scratch.
    """
    M, K = x.shape
    K2, N = w.shape
    assert K == K2, (K, K2)

    tm = min(tm, _round_up(M, 8))
    tn = min(tn, _round_up(N, 128))
    tk = min(tk, _round_up(K, 128))
    Mp, Kp, Np = _round_up(M, tm), _round_up(K, tk), _round_up(N, tn)

    xp = jnp.pad(x, ((0, Mp - M), (0, Kp - K))).astype(jnp.bfloat16)
    wp = jnp.pad(w, ((0, Kp - K), (0, Np - N))).astype(jnp.bfloat16)
    bp = jnp.pad(b, (0, Np - N)).reshape(1, Np).astype(jnp.float32)

    kern = functools.partial(_matmul_bias_act_kernel, apply_relu=relu)
    out = pl.pallas_call(
        kern,
        out_shape=jax.ShapeDtypeStruct((Mp, Np), jnp.float32),
        grid_spec=pltpu.PrefetchScalarGridSpec(
            num_scalar_prefetch=0,
            grid=(Mp // tm, Np // tn, Kp // tk),
            in_specs=[
                pl.BlockSpec((tm, tk), lambda i, j, k: (i, k)),
                pl.BlockSpec((tk, tn), lambda i, j, k: (k, j)),
                pl.BlockSpec((1, tn), lambda i, j, k: (0, j)),
            ],
            out_specs=pl.BlockSpec((tm, tn), lambda i, j, k: (i, j)),
            scratch_shapes=[pltpu.VMEM((tm, tn), jnp.float32)],
        ),
        compiler_params=pltpu.CompilerParams(
            dimension_semantics=("parallel", "parallel", "arbitrary")),
    )(xp, wp, bp)
    return out[:M, :N]


# ----------------------------------------------------------------------------
# Pallas kernel: fused 3-layer classifier MLP.
#   layer1 (large K) is tiled over the K grid axis into the accumulator;
#   layers 2/3 run in the last-K epilogue (hidden dims fit a single VMEM block).
#   Dropout(p) between layers: identity (eval / inference semantics).
# ----------------------------------------------------------------------------
def _classifier_kernel(x_ref, w1_ref, b1_ref, w2_ref, b2_ref, w3_ref, b3_ref,
                       o_ref, acc_ref):
    k = pl.program_id(1)

    @pl.when(k == 0)
    def _():
        acc_ref[...] = jnp.zeros_like(acc_ref)

    acc_ref[...] += jnp.dot(x_ref[...], w1_ref[...],
                            preferred_element_type=jnp.float32)

    @pl.when(k == pl.num_programs(1) - 1)
    def _():
        h1 = jnp.maximum(acc_ref[...] + b1_ref[...], 0.0)
        # Dropout(p): identity in eval mode.
        h2 = jnp.dot(h1.astype(jnp.bfloat16), w2_ref[...],
                     preferred_element_type=jnp.float32) + b2_ref[...]
        h2 = jnp.maximum(h2, 0.0)
        # Dropout(p): identity in eval mode.
        out = jnp.dot(h2.astype(jnp.bfloat16), w3_ref[...],
                      preferred_element_type=jnp.float32) + b3_ref[...]
        o_ref[...] = out.astype(o_ref.dtype)


def classifier_forward(x, cls_params, *, tm=256, tk=512):
    (w1, b1), (w2, b2), (w3, b3) = cls_params
    M, K1 = x.shape
    H1 = w1.shape[1]
    H2 = w2.shape[1]
    NC = w3.shape[1]

    tm = min(tm, _round_up(M, 8))
    tk = min(tk, _round_up(K1, 128))
    Mp, K1p = _round_up(M, tm), _round_up(K1, tk)
    H1p, H2p, NCp = _round_up(H1, 128), _round_up(H2, 128), _round_up(NC, 128)

    xp = jnp.pad(x, ((0, Mp - M), (0, K1p - K1))).astype(jnp.bfloat16)
    w1p = jnp.pad(w1, ((0, K1p - K1), (0, H1p - H1))).astype(jnp.bfloat16)
    b1p = jnp.pad(b1, (0, H1p - H1)).reshape(1, H1p).astype(jnp.float32)
    w2p = jnp.pad(w2, ((0, H1p - H1), (0, H2p - H2))).astype(jnp.bfloat16)
    b2p = jnp.pad(b2, (0, H2p - H2)).reshape(1, H2p).astype(jnp.float32)
    w3p = jnp.pad(w3, ((0, H2p - H2), (0, NCp - NC))).astype(jnp.bfloat16)
    b3p = jnp.pad(b3, (0, NCp - NC)).reshape(1, NCp).astype(jnp.float32)

    out = pl.pallas_call(
        _classifier_kernel,
        out_shape=jax.ShapeDtypeStruct((Mp, NCp), jnp.float32),
        grid_spec=pltpu.PrefetchScalarGridSpec(
            num_scalar_prefetch=0,
            grid=(Mp // tm, K1p // tk),
            in_specs=[
                pl.BlockSpec((tm, tk), lambda i, k: (i, k)),
                pl.BlockSpec((tk, H1p), lambda i, k: (k, 0)),
                pl.BlockSpec((1, H1p), lambda i, k: (0, 0)),
                pl.BlockSpec((H1p, H2p), lambda i, k: (0, 0)),
                pl.BlockSpec((1, H2p), lambda i, k: (0, 0)),
                pl.BlockSpec((H2p, NCp), lambda i, k: (0, 0)),
                pl.BlockSpec((1, NCp), lambda i, k: (0, 0)),
            ],
            out_specs=pl.BlockSpec((tm, NCp), lambda i, k: (i, 0)),
            scratch_shapes=[pltpu.VMEM((tm, H1p), jnp.float32)],
        ),
        compiler_params=pltpu.CompilerParams(
            dimension_semantics=("parallel", "arbitrary")),
    )(xp, w1p, b1p, w2p, b2p, w3p, b3p)
    return out[:M, :NC]


# ----------------------------------------------------------------------------
# Conv 3x3 (pad=1, stride=1) + ReLU, via im2col + the tiled Pallas matmul.
# (Folding the 9-offset im2col into the kernel's K loop is a further
#  optimization for full-size VGG; at these shapes the glue is cheap.)
# ----------------------------------------------------------------------------
def conv3x3_relu(x_nhwc, w_hwio, b):
    N, H, W, Cin = x_nhwc.shape
    KH, KW, Cin2, Cout = w_hwio.shape
    assert (KH, KW, Cin2) == (3, 3, Cin)
    xp = jnp.pad(x_nhwc, ((0, 0), (1, 1), (1, 1), (0, 0)))
    cols = [xp[:, i:i + H, j:j + W, :] for i in range(KH) for j in range(KW)]
    # patch feature order is (ki, kj, cin) — matches w_hwio.reshape below.
    patches = jnp.concatenate(cols, axis=-1).reshape(N * H * W, KH * KW * Cin)
    w2 = w_hwio.reshape(KH * KW * Cin, Cout)
    y = matmul_bias_act(patches, w2, b, relu=True)
    return y.reshape(N, H, W, Cout)


def maxpool2x2(x_nhwc):
    N, H, W, C = x_nhwc.shape
    return x_nhwc.reshape(N, H // 2, 2, W // 2, 2, C).max(axis=(2, 4))


# ----------------------------------------------------------------------------
# Parameter construction (deterministic, mirrors VGG_2view._initialize_weights).
# ----------------------------------------------------------------------------
def make_feature_params(key, in_ch, cfg):
    """VGG-style feature stack: ints -> Conv3x3+ReLU, 'M' -> MaxPool2x2."""
    params = []
    c = in_ch
    for v in cfg:
        if v == "M":
            params.append(("M", None))
        else:
            key, sub = jax.random.split(key)
            # Conv2d init: normal(0, sqrt(2 / (kh*kw*out_channels))), bias = 0.
            std = math.sqrt(2.0 / (3 * 3 * v))
            w = std * jax.random.normal(sub, (3, 3, c, v), jnp.float32)
            b = jnp.zeros((v,), jnp.float32)
            params.append(("C", (w, b)))
            c = v
    return params, c, key


def make_linear_params(key, in_dim, out_dim):
    # Linear init: normal(0, 0.01), bias = 0.  Stored as (in, out).
    key, sub = jax.random.split(key)
    w = 0.01 * jax.random.normal(sub, (in_dim, out_dim), jnp.float32)
    b = jnp.zeros((out_dim,), jnp.float32)
    return (w, b), key


def nhwc_flatten_perm(C, H, W):
    """perm[r] = PyTorch (C,H,W) flat index of the element at NHWC flat index r."""
    idx = jnp.arange(C * H * W).reshape(C, H, W)
    return jnp.transpose(idx, (1, 2, 0)).reshape(-1)


def absorb_flatten_order_into_w1(w1_torch, feat_dim, perm):
    """Permute rows of w1 (built in PyTorch NCHW-flatten order) so that
    multiplying against NHWC-flattened features gives identical results."""
    v1 = w1_torch[:feat_dim][perm]
    v2 = w1_torch[feat_dim:][perm]
    return jnp.concatenate([v1, v2], axis=0)


# ----------------------------------------------------------------------------
# Forward pass.
# ----------------------------------------------------------------------------
def run_features(x_nchw, params):
    x = jnp.transpose(x_nchw, (0, 2, 3, 1))            # NCHW -> NHWC (once)
    for kind, p in params:
        if kind == "M":
            x = maxpool2x2(x)
        else:
            w, b = p
            x = conv3x3_relu(x, w, b)
    # Stay in NHWC: the flatten-order difference vs PyTorch's x.view(N, -1)
    # is absorbed into a one-time row permutation of classifier w1.
    return x.reshape(x.shape[0], -1)


def vgg_2view_forward(x1, x2, feat1_params, feat2_params, cls_params):
    f1 = run_features(x1, feat1_params)
    f2 = run_features(x2, feat2_params)
    x = jnp.concatenate([f1, f2], axis=1)               # cat on feature dim
    return classifier_forward(x, cls_params)            # fused 3-layer MLP


if __name__ == "__main__":
    key = jax.random.PRNGKey(0)

    # Small shapes consistent with the module: batch=2, in_channels=4, 16x16 images.
    batch, in_ch, spatial = 2, 4, 16
    cfg = [8, "M", 16, "M"]          # small VGG-style feature config (per view)
    hidden, num_classes = 64, 10     # scaled-down analogue of 4096 / 1000

    feat1_params, feat_ch, key = make_feature_params(key, in_ch, cfg)
    feat2_params, _, key = make_feature_params(key, in_ch, cfg)

    final_spatial = spatial // (2 ** sum(1 for v in cfg if v == "M"))
    feat_dim = feat_ch * final_spatial * final_spatial       # per-view flat dim
    cls_in = feat_dim * 2                                    # analogue of 512*7*7*2

    (w1_torch, b1), key = make_linear_params(key, cls_in, hidden)
    (w2, b2), key = make_linear_params(key, hidden, hidden)
    (w3, b3), key = make_linear_params(key, hidden, num_classes)

    # Absorb PyTorch NCHW-flatten ordering into w1 (features stay NHWC).
    perm = nhwc_flatten_perm(feat_ch, final_spatial, final_spatial)
    w1 = absorb_flatten_order_into_w1(w1_torch, feat_dim, perm)
    cls_params = ((w1, b1), (w2, b2), (w3, b3))

    key, k1, k2 = jax.random.split(key, 3)
    x1 = jax.random.normal(k1, (batch, in_ch, spatial, spatial), jnp.float32)
    x2 = jax.random.normal(k2, (batch, in_ch, spatial, spatial), jnp.float32)

    fwd = jax.jit(
        lambda a, b: vgg_2view_forward(a, b, feat1_params, feat2_params, cls_params)
    )
    out = fwd(x1, x2)
    jax.block_until_ready(out)
    assert out.shape == (batch, num_classes), out.shape
    assert bool(jnp.all(jnp.isfinite(out)))
    print("KERNEL_OK")
</pallas_src>

<mosaic_0001>
module attributes {stable_mosaic.version = 11 : i64} {
  func.func @_matmul_bias_act_kernel(%arg0: i32, %arg1: i32, %arg2: i32, %arg3: memref<256x128xbf16, #tpu.memory_space<vmem>>, %arg4: memref<128x128xbf16, #tpu.memory_space<vmem>>, %arg5: memref<1x128xf32, #tpu.memory_space<vmem>>, %arg6: memref<256x128xf32, #tpu.memory_space<vmem>>, %arg7: memref<256x128xf32, #tpu.memory_space<vmem>>) attributes {dimension_semantics = [#tpu.dimension_semantics<parallel>, #tpu.dimension_semantics<parallel>, #tpu.dimension_semantics<arbitrary>], iteration_bounds = array<i64: 2, 1, 1>, scalar_prefetch = 0 : i64, scratch_operands = 1 : i64, tpu.core_type = #tpu.core_type<tc>, window_params = [{transform_indices = @transform_0, window_bounds = array<i64: 256, 128>}, {transform_indices = @transform_1, window_bounds = array<i64: 128, 128>}, {transform_indices = @transform_2, window_bounds = array<i64: 1, 128>}, {transform_indices = @transform_3, window_bounds = array<i64: 256, 128>}]} {
    %c0_i32 = arith.constant 0 : i32
    %0 = arith.cmpi eq, %arg2, %c0_i32 : i32
    %1 = arith.extui %0 : i1 to i32
    %c0_i32_0 = arith.constant 0 : i32
    %2 = arith.cmpi ne, %1, %c0_i32_0 : i32
    scf.if %2 {
      %cst_10 = arith.constant 0.000000e+00 : f32
      %12 = vector.broadcast %cst_10 : f32 to vector<256x128xf32>
      %c0_11 = arith.constant 0 : index
      %c0_12 = arith.constant 0 : index
      %13 = vector.load %arg7[%c0_11, %c0_12] : memref<256x128xf32, #tpu.memory_space<vmem>>, vector<256x128xf32>
      tpu.vector_store %arg7[%c0_11, %c0_12], %12 {strides = array<i32>} : memref<256x128xf32, #tpu.memory_space<vmem>>, vector<256x128xf32>,
    } else {
    }
    %c0 = arith.constant 0 : index
    %c0_1 = arith.constant 0 : index
    %3 = vector.load %arg7[%c0, %c0_1] : memref<256x128xf32, #tpu.memory_space<vmem>>, vector<256x128xf32>
    %c0_2 = arith.constant 0 : index
    %c0_3 = arith.constant 0 : index
    %4 = vector.load %arg3[%c0_2, %c0_3] : memref<256x128xbf16, #tpu.memory_space<vmem>>, vector<256x128xbf16>
    %c0_4 = arith.constant 0 : index
    %c0_5 = arith.constant 0 : index
    %5 = vector.load %arg4[%c0_4, %c0_5] : memref<128x128xbf16, #tpu.memory_space<vmem>>, vector<128x128xbf16>
    %cst = arith.constant dense<0.000000e+00> : vector<256x128xf32>
    %6 = tpu.matmul %4, %5, %cst {dimension_numbers = #tpu.dot_dimension_numbers<[1], [0], [0], [1], [0, 0, 1, 1], [], []>} : vector<256x128xbf16>, vector<128x128xbf16>, vector<256x128xf32> -> vector<256x128xf32>
    %7 = arith.addf %3, %6 : vector<256x128xf32>
    %c0_6 = arith.constant 0 : index
    %c0_7 = arith.constant 0 : index
    %8 = vector.load %arg7[%c0_6, %c0_7] : memref<256x128xf32, #tpu.memory_space<vmem>>, vector<256x128xf32>
    tpu.vector_store %arg7[%c0_6, %c0_7], %7 {strides = array<i32>} : memref<256x128xf32, #tpu.memory_space<vmem>>, vector<256x128xf32>,
    %c0_i32_8 = arith.constant 0 : i32
    %9 = arith.cmpi eq, %arg2, %c0_i32_8 : i32
    %10 = arith.extui %9 : i1 to i32
    %c0_i32_9 = arith.constant 0 : i32
    %11 = arith.cmpi ne, %10, %c0_i32_9 : i32
    scf.if %11 {
      %c0_10 = arith.constant 0 : index
      %c0_11 = arith.constant 0 : index
      %12 = vector.load %arg7[%c0_10, %c0_11] : memref<256x128xf32, #tpu.memory_space<vmem>>, vector<256x128xf32>
      %c0_12 = arith.constant 0 : index
      %c0_13 = arith.constant 0 : index
      %13 = vector.load %arg5[%c0_12, %c0_13] : memref<1x128xf32, #tpu.memory_space<vmem>>, vector<1x128xf32>
      %14 = vector.broadcast %13 : vector<1x128xf32> to vector<256x128xf32>
      %15 = arith.addf %12, %14 : vector<256x128xf32>
      %cst_14 = arith.constant 0.000000e+00 : f32
      %16 = vector.broadcast %cst_14 : f32 to vector<256x128xf32>
      %17 = arith.maximumf %15, %16 : vector<256x128xf32>
      %c0_15 = arith.constant 0 : index
      %c0_16 = arith.constant 0 : index
      %18 = vector.load %arg6[%c0_15, %c0_16] : memref<256x128xf32, #tpu.memory_space<vmem>>, vector<256x128xf32>
      tpu.vector_store %arg6[%c0_15, %c0_16], %17 {strides = array<i32>} : memref<256x128xf32, #tpu.memory_space<vmem>>, vector<256x128xf32>,
    } else {
    }
    return
  }
  func.func @transform_0(%arg0: i32, %arg1: i32, %arg2: i32) -> (i32, i32) {
    %c0_i32 = arith.constant 0 : i32
    return %arg0, %arg2 : i32, i32
  }
  func.func @transform_1(%arg0: i32, %arg1: i32, %arg2: i32) -> (i32, i32) {
    %c0_i32 = arith.constant 0 : i32
    return %arg2, %arg1 : i32, i32
  }
  func.func @transform_2(%arg0: i32, %arg1: i32, %arg2: i32) -> (i32, i32) {
    %c0_i32 = arith.constant 0 : i32
    %c0_i32_0 = arith.constant 0 : i32
    return %c0_i32, %arg1 : i32, i32
  }
  func.func @transform_3(%arg0: i32, %arg1: i32, %arg2: i32) -> (i32, i32) {
    %c0_i32 = arith.constant 0 : i32
    return %arg0, %arg1 : i32, i32
  }
}

module attributes {stable_mosaic.version = 11 : i64} {
  func.func @_matmul_bias_act_kernel(%arg0: i32, %arg1: i32, %arg2: i32, %arg3: memref<128x128xbf16, #tpu.memory_space<vmem>>, %arg4: memref<128x128xbf16, #tpu.memory_space<vmem>>, %arg5: memref<1x128xf32, #tpu.memory_space<vmem>>, %arg6: memref<128x128xf32, #tpu.memory_space<vmem>>, %arg7: memref<128x128xf32, #tpu.memory_space<vmem>>) attributes {dimension_semantics = [#tpu.dimension_semantics<parallel>, #tpu.dimension_semantics<parallel>, #tpu.dimension_semantics<arbitrary>], iteration_bounds = array<i64: 1, 1, 1>, scalar_prefetch = 0 : i64, scratch_operands = 1 : i64, tpu.core_type = #tpu.core_type<tc>, window_params = [{transform_indices = @transform_0, window_bounds = array<i64: 128, 128>}, {transform_indices = @transform_1, window_bounds = array<i64: 128, 128>}, {transform_indices = @transform_2, window_bounds = array<i64: 1, 128>}, {transform_indices = @transform_3, window_bounds = array<i64: 128, 128>}]} {
    %c0_i32 = arith.constant 0 : i32
    %0 = arith.cmpi eq, %arg2, %c0_i32 : i32
    %1 = arith.extui %0 : i1 to i32
    %c0_i32_0 = arith.constant 0 : i32
    %2 = arith.cmpi ne, %1, %c0_i32_0 : i32
    scf.if %2 {
      %cst_10 = arith.constant 0.000000e+00 : f32
      %12 = vector.broadcast %cst_10 : f32 to vector<128x128xf32>
      %c0_11 = arith.constant 0 : index
      %c0_12 = arith.constant 0 : index
      %13 = vector.load %arg7[%c0_11, %c0_12] : memref<128x128xf32, #tpu.memory_space<vmem>>, vector<128x128xf32>
      tpu.vector_store %arg7[%c0_11, %c0_12], %12 {strides = array<i32>} : memref<128x128xf32, #tpu.memory_space<vmem>>, vector<128x128xf32>,
    } else {
    }
    %c0 = arith.constant 0 : index
    %c0_1 = arith.constant 0 : index
    %3 = vector.load %arg7[%c0, %c0_1] : memref<128x128xf32, #tpu.memory_space<vmem>>, vector<128x128xf32>
    %c0_2 = arith.constant 0 : index
    %c0_3 = arith.constant 0 : index
    %4 = vector.load %arg3[%c0_2, %c0_3] : memref<128x128xbf16, #tpu.memory_space<vmem>>, vector<128x128xbf16>
    %c0_4 = arith.constant 0 : index
    %c0_5 = arith.constant 0 : index
    %5 = vector.load %arg4[%c0_4, %c0_5] : memref<128x128xbf16, #tpu.memory_space<vmem>>, vector<128x128xbf16>
    %cst = arith.constant dense<0.000000e+00> : vector<128x128xf32>
    %6 = tpu.matmul %4, %5, %cst {dimension_numbers = #tpu.dot_dimension_numbers<[1], [0], [0], [1], [0, 0, 1, 1], [], []>} : vector<128x128xbf16>, vector<128x128xbf16>, vector<128x128xf32> -> vector<128x128xf32>
    %7 = arith.addf %3, %6 : vector<128x128xf32>
    %c0_6 = arith.constant 0 : index
    %c0_7 = arith.constant 0 : index
    %8 = vector.load %arg7[%c0_6, %c0_7] : memref<128x128xf32, #tpu.memory_space<vmem>>, vector<128x128xf32>
    tpu.vector_store %arg7[%c0_6, %c0_7], %7 {strides = array<i32>} : memref<128x128xf32, #tpu.memory_space<vmem>>, vector<128x128xf32>,
    %c0_i32_8 = arith.constant 0 : i32
    %9 = arith.cmpi eq, %arg2, %c0_i32_8 : i32
    %10 = arith.extui %9 : i1 to i32
    %c0_i32_9 = arith.constant 0 : i32
    %11 = arith.cmpi ne, %10, %c0_i32_9 : i32
    scf.if %11 {
      %c0_10 = arith.constant 0 : index
      %c0_11 = arith.constant 0 : index
      %12 = vector.load %arg7[%c0_10, %c0_11] : memref<128x128xf32, #tpu.memory_space<vmem>>, vector<128x128xf32>
      %c0_12 = arith.constant 0 : index
      %c0_13 = arith.constant 0 : index
      %13 = vector.load %arg5[%c0_12, %c0_13] : memref<1x128xf32, #tpu.memory_space<vmem>>, vector<1x128xf32>
      %14 = vector.broadcast %13 : vector<1x128xf32> to vector<128x128xf32>
      %15 = arith.addf %12, %14 : vector<128x128xf32>
      %cst_14 = arith.constant 0.000000e+00 : f32
      %16 = vector.broadcast %cst_14 : f32 to vector<128x128xf32>
      %17 = arith.maximumf %15, %16 : vector<128x128xf32>
      %c0_15 = arith.constant 0 : index
      %c0_16 = arith.constant 0 : index
      %18 = vector.load %arg6[%c0_15, %c0_16] : memref<128x128xf32, #tpu.memory_space<vmem>>, vector<128x128xf32>
      tpu.vector_store %arg6[%c0_15, %c0_16], %17 {strides = array<i32>} : memref<128x128xf32, #tpu.memory_space<vmem>>, vector<128x128xf32>,
    } else {
    }
    return
  }
  func.func @transform_0(%arg0: i32, %arg1: i32, %arg2: i32) -> (i32, i32) {
    %c0_i32 = arith.constant 0 : i32
    return %arg0, %arg2 : i32, i32
  }
  func.func @transform_1(%arg0: i32, %arg1: i32, %arg2: i32) -> (i32, i32) {
    %c0_i32 = arith.constant 0 : i32
    return %arg2, %arg1 : i32, i32
  }
  func.func @transform_2(%arg0: i32, %arg1: i32, %arg2: i32) -> (i32, i32) {
    %c0_i32 = arith.constant 0 : i32
    %c0_i32_0 = arith.constant 0 : i32
    return %c0_i32, %arg1 : i32, i32
  }
  func.func @transform_3(%arg0: i32, %arg1: i32, %arg2: i32) -> (i32, i32) {
    %c0_i32 = arith.constant 0 : i32
    return %arg0, %arg1 : i32, i32
  }
}

module attributes {stable_mosaic.version = 11 : i64} {
  func.func @_classifier_kernel(%arg0: i32, %arg1: i32, %arg2: memref<8x512xbf16, #tpu.memory_space<vmem>>, %arg3: memref<512x128xbf16, #tpu.memory_space<vmem>>, %arg4: memref<1x128xf32, #tpu.memory_space<vmem>>, %arg5: memref<128x128xbf16, #tpu.memory_space<vmem>>, %arg6: memref<1x128xf32, #tpu.memory_space<vmem>>, %arg7: memref<128x128xbf16, #tpu.memory_space<vmem>>, %arg8: memref<1x128xf32, #tpu.memory_space<vmem>>, %arg9: memref<8x128xf32, #tpu.memory_space<vmem>>, %arg10: memref<8x128xf32, #tpu.memory_space<vmem>>) attributes {dimension_semantics = [#tpu.dimension_semantics<parallel>, #tpu.dimension_semantics<arbitrary>], iteration_bounds = array<i64: 1, 1>, scalar_prefetch = 0 : i64, scratch_operands = 1 : i64, tpu.core_type = #tpu.core_type<tc>, window_params = [{transform_indices = @transform_0, window_bounds = array<i64: 8, 512>}, {transform_indices = @transform_1, window_bounds = array<i64: 512, 128>}, {pipeline_mode = #tpu.pipeline_mode<synchronous>, transform_indices = @transform_2, window_bounds = array<i64: 1, 128>}, {pipeline_mode = #tpu.pipeline_mode<synchronous>, transform_indices = @transform_3, window_bounds = array<i64: 128, 128>}, {pipeline_mode = #tpu.pipeline_mode<synchronous>, transform_indices = @transform_4, window_bounds = array<i64: 1, 128>}, {pipeline_mode = #tpu.pipeline_mode<synchronous>, transform_indices = @transform_5, window_bounds = array<i64: 128, 128>}, {pipeline_mode = #tpu.pipeline_mode<synchronous>, transform_indices = @transform_6, window_bounds = array<i64: 1, 128>}, {transform_indices = @transform_7, window_bounds = array<i64: 8, 128>}]} {
    %c0_i32 = arith.constant 0 : i32
    %0 = arith.cmpi eq, %arg1, %c0_i32 : i32
    %1 = arith.extui %0 : i1 to i32
    %c0_i32_0 = arith.constant 0 : i32
    %2 = arith.cmpi ne, %1, %c0_i32_0 : i32
    scf.if %2 {
      %cst_10 = arith.constant 0.000000e+00 : f32
      %12 = vector.broadcast %cst_10 : f32 to vector<8x128xf32>
      %c0_11 = arith.constant 0 : index
      %c0_12 = arith.constant 0 : index
      %13 = vector.load %arg10[%c0_11, %c0_12] : memref<8x128xf32, #tpu.memory_space<vmem>>, vector<8x128xf32>
      tpu.vector_store %arg10[%c0_11, %c0_12], %12 {strides = array<i32>} : memref<8x128xf32, #tpu.memory_space<vmem>>, vector<8x128xf32>,
    } else {
    }
    %c0 = arith.constant 0 : index
    %c0_1 = arith.constant 0 : index
    %3 = vector.load %arg10[%c0, %c0_1] : memref<8x128xf32, #tpu.memory_space<vmem>>, vector<8x128xf32>
    %c0_2 = arith.constant 0 : index
    %c0_3 = arith.constant 0 : index
    %4 = vector.load %arg2[%c0_2, %c0_3] : memref<8x512xbf16, #tpu.memory_space<vmem>>, vector<8x512xbf16>
    %c0_4 = arith.constant 0 : index
    %c0_5 = arith.constant 0 : index
    %5 = vector.load %arg3[%c0_4, %c0_5] : memref<512x128xbf16, #tpu.memory_space<vmem>>, vector<512x128xbf16>
    %cst = arith.constant dense<0.000000e+00> : vector<8x128xf32>
    %6 = tpu.matmul %4, %5, %cst {dimension_numbers = #tpu.dot_dimension_numbers<[1], [0], [0], [1], [0, 0, 1, 1], [], []>} : vector<8x512xbf16>, vector<512x128xbf16>, vector<8x128xf32> -> vector<8x128xf32>
    %7 = arith.addf %3, %6 : vector<8x128xf32>
    %c0_6 = arith.constant 0 : index
    %c0_7 = arith.constant 0 : index
    %8 = vector.load %arg10[%c0_6, %c0_7] : memref<8x128xf32, #tpu.memory_space<vmem>>, vector<8x128xf32>
    tpu.vector_store %arg10[%c0_6, %c0_7], %7 {strides = array<i32>} : memref<8x128xf32, #tpu.memory_space<vmem>>, vector<8x128xf32>,
    %c0_i32_8 = arith.constant 0 : i32
    %9 = arith.cmpi eq, %arg1, %c0_i32_8 : i32
    %10 = arith.extui %9 : i1 to i32
    %c0_i32_9 = arith.constant 0 : i32
    %11 = arith.cmpi ne, %10, %c0_i32_9 : i32
    scf.if %11 {
      %c0_10 = arith.constant 0 : index
      %c0_11 = arith.constant 0 : index
      %12 = vector.load %arg10[%c0_10, %c0_11] : memref<8x128xf32, #tpu.memory_space<vmem>>, vector<8x128xf32>
      %c0_12 = arith.constant 0 : index
      %c0_13 = arith.constant 0 : index
      %13 = vector.load %arg4[%c0_12, %c0_13] : memref<1x128xf32, #tpu.memory_space<vmem>>, vector<1x128xf32>
      %14 = vector.broadcast %13 : vector<1x128xf32> to vector<8x128xf32>
      %15 = arith.addf %12, %14 : vector<8x128xf32>
      %cst_14 = arith.constant 0.000000e+00 : f32
      %16 = vector.broadcast %cst_14 : f32 to vector<8x128xf32>
      %17 = arith.maximumf %15, %16 : vector<8x128xf32>
      %18 = arith.truncf %17 : vector<8x128xf32> to vector<8x128xbf16>
      %c0_15 = arith.constant 0 : index
      %c0_16 = arith.constant 0 : index
      %19 = vector.load %arg5[%c0_15, %c0_16] : memref<128x128xbf16, #tpu.memory_space<vmem>>, vector<128x128xbf16>
      %cst_17 = arith.constant dense<0.000000e+00> : vector<8x128xf32>
      %20 = tpu.matmul %18, %19, %cst_17 {dimension_numbers = #tpu.dot_dimension_numbers<[1], [0], [0], [1], [0, 0, 1, 1], [], []>} : vector<8x128xbf16>, vector<128x128xbf16>, vector<8x128xf32> -> vector<8x128xf32>
      %c0_18 = arith.constant 0 : index
      %c0_19 = arith.constant 0 : index
      %21 = vector.load %arg6[%c0_18, %c0_19] : memref<1x128xf32, #tpu.memory_space<vmem>>, vector<1x128xf32>
      %22 = vector.broadcast %21 : vector<1x128xf32> to vector<8x128xf32>
      %23 = arith.addf %20, %22 : vector<8x128xf32>
      %cst_20 = arith.constant 0.000000e+00 : f32
      %24 = vector.broadcast %cst_20 : f32 to vector<8x128xf32>
      %25 = arith.maximumf %23, %24 : vector<8x128xf32>
      %26 = arith.truncf %25 : vector<8x128xf32> to vector<8x128xbf16>
      %c0_21 = arith.constant 0 : index
      %c0_22 = arith.constant 0 : index
      %27 = vector.load %arg7[%c0_21, %c0_22] : memref<128x128xbf16, #tpu.memory_space<vmem>>, vector<128x128xbf16>
      %cst_23 = arith.constant dense<0.000000e+00> : vector<8x128xf32>
      %28 = tpu.matmul %26, %27, %cst_23 {dimension_numbers = #tpu.dot_dimension_numbers<[1], [0], [0], [1], [0, 0, 1, 1], [], []>} : vector<8x128xbf16>, vector<128x128xbf16>, vector<8x128xf32> -> vector<8x128xf32>
      %c0_24 = arith.constant 0 : index
      %c0_25 = arith.constant 0 : index
      %29 = vector.load %arg8[%c0_24, %c0_25] : memref<1x128xf32, #tpu.memory_space<vmem>>, vector<1x128xf32>
      %30 = vector.broadcast %29 : vector<1x128xf32> to vector<8x128xf32>
      %31 = arith.addf %28, %30 : vector<8x128xf32>
      %c0_26 = arith.constant 0 : index
      %c0_27 = arith.constant 0 : index
      %32 = vector.load %arg9[%c0_26, %c0_27] : memref<8x128xf32, #tpu.memory_space<vmem>>, vector<8x128xf32>
      tpu.vector_store %arg9[%c0_26, %c0_27], %31 {strides = array<i32>} : memref<8x128xf32, #tpu.memory_space<vmem>>, vector<8x128xf32>,
    } else {
    }
    return
  }
  func.func @transform_0(%arg0: i32, %arg1: i32) -> (i32, i32) {
    %c0_i32 = arith.constant 0 : i32
    return %arg0, %arg1 : i32, i32
  }
  func.func @transform_1(%arg0: i32, %arg1: i32) -> (i32, i32) {
    %c0_i32 = arith.constant 0 : i32
    %c0_i32_0 = arith.constant 0 : i32
    return %arg1, %c0_i32 : i32, i32
  }
  func.func @transform_2(%arg0: i32, %arg1: i32) -> (i32, i32) {
    %c0_i32 = arith.constant 0 : i32
    %c0_i32_0 = arith.constant 0 : i32
    %c0_i32_1 = arith.constant 0 : i32
    return %c0_i32, %c0_i32_0 : i32, i32
  }
  func.func @transform_3(%arg0: i32, %arg1: i32) -> (i32, i32) {
    %c0_i32 = arith.constant 0 : i32
    %c0_i32_0 = arith.constant 0 : i32
    %c0_i32_1 = arith.constant 0 : i32
    return %c0_i32, %c0_i32_0 : i32, i32
  }
  func.func @transform_4(%arg0: i32, %arg1: i32) -> (i32, i32) {
    %c0_i32 = arith.constant 0 : i32
    %c0_i32_0 = arith.constant 0 : i32
    %c0_i32_1 = arith.constant 0 : i32
    return %c0_i32, %c0_i32_0 : i32, i32
  }
  func.func @transform_5(%arg0: i32, %arg1: i32) -> (i32, i32) {
    %c0_i32 = arith.constant 0 : i32
    %c0_i32_0 = arith.constant 0 : i32
    %c0_i32_1 = arith.constant 0 : i32
    return %c0_i32, %c0_i32_0 : i32, i32
  }
  func.func @transform_6(%arg0: i32, %arg1: i32) -> (i32, i32) {
    %c0_i32 = arith.constant 0 : i32
    %c0_i32_0 = arith.constant 0 : i32
    %c0_i32_1 = arith.constant 0 : i32
    return %c0_i32, %c0_i32_0 : i32, i32
  }
  func.func @transform_7(%arg0: i32, %arg1: i32) -> (i32, i32) {
    %c0_i32 = arith.constant 0 : i32
    %c0_i32_0 = arith.constant 0 : i32
    return %arg0, %c0_i32 : i32, i32
  }
}

</mosaic_0001>

<bundles_post_ra>
// kernel: _lambda_.5
= control target key start
LH: loop header
LB: loop body
LE: loop exit
PB: predicated region body
PF: predicated region fallthrough
CT: control target
= control target key end

     0   :  { %s1212_s12 = smov 0   ;;  %s1214_s13 = smov 0   ;;  %s1362_s0 = inlined_call_operand.vmem [shape: bf16[512,128], index: 0, kind: input, shape index: {}]   ;;  %s1363_s1 = inlined_call_operand.vmem [shape: bf16[128,128], index: 1, kind: input, shape index: {}]   ;;  %s1364_s2 = inlined_call_operand.vmem [shape: f32[1,128], index: 2, kind: input, shape index: {}]   ;;  %s1365_s3 = inlined_call_operand.vmem [shape: f32[512,128], index: 3, kind: output, shape index: {}]  }
   0x1   :  { %s1216_s14 = smov 0  }
   0x2 LB: > { %s32_s15 = sadd.s32 1, %s1186_s13  ;;  %p1000_p0 = scmp.ge.s32.totalorder %s1190_s14, 1  ;;  %s1190_s14 = sphi %s1216_s14, %s13_s14   ;;  %s1186_s13 = sphi %s1214_s13, %s1367_s13   ;;  %s1182_s12 = sphi %s1212_s12, %s1366_s12  }
   0x3   : > { %p34_p1 = scmp.ge.s32.totalorder %s32_s15, 2  ;;  %p188_p2 = scmp.lt.s32.totalorder %s1190_s14, 3 }
   0x5   : > { %s1369_s15 = smov (%p34_p1, %s32_s15), 0  ;;  %p189_p3 = pnand %p1000_p0, %p188_p2 }
   0x6   : > { %v1144_v0 = vld [vmem:[%s1363_s1] sm:$0xff] (!%p189_p3)   ;;  %s1001_s18 = sshll.u32 (!%p189_p3), %s1182_s12, 5  ;;  %v1145_v1 = vld [vmem:[%s1363_s1 + $0x8] sm:$0xff] (!%p189_p3)   ;;  %v1146_v2 = vld [vmem:[%s1363_s1 + $0x10] sm:$0xff] (!%p189_p3)  }
   0x7   : > { %192 = sbr.rel (%p189_p3) target bundleno = 283 (0x11b), region = 32  ;;  %p230_p4 = scmp.lt.s32.totalorder (!%p189_p3), %s1001_s18, 63  ;;  %1056 = vmatprep.subr.bf16.mxu0 (!%p189_p3), %v1144_v0  ;;  %1104 = vmatprep.subr.bf16.mxu1 (!%p189_p3), %v1144_v0  ;;  %v1147_v3 = vld [vmem:[%s1363_s1 + $0x18] sm:$0xff] (!%p189_p3)   ;;  %v1148_v6 = vld [vmem:[%s1363_s1 + $0x20] sm:$0xff] (!%p189_p3)   ;;  %v1149_v7 = vld [vmem:[%s1363_s1 + $0x28] sm:$0xff] (!%p189_p3)  }
   0x8   : > { %1057 = vmatpush3.bf16.msra.mxu0 (!%p189_p3), %v1144_v0  ;;  %1112 = vmatpush3.bf16.msra.mxu1 (!%p189_p3), %v1144_v0  ;;  %v1150_v8 = vld [vmem:[%s1363_s1 + $0x30] sm:$0xff] (!%p189_p3)   ;;  %v1151_v9 = vld [vmem:[%s1363_s1 + $0x38] sm:$0xff] (!%p189_p3)   ;;  %v1281_v24 = vld [vmem:[%s1364_s2] ss:$0 sm:$0xff] (!%p189_p3) }
   0x9   : > { %1058 = vmatprep.subr.bf16.mxu0 (!%p189_p3), %v1145_v1  ;;  %1105 = vmatprep.subr.bf16.mxu1 (!%p189_p3), %v1145_v1 }
   0xc   : > { %1059 = vmatpush3.bf16.msra.mxu0 (!%p189_p3), %v1145_v1  ;;  %1113 = vmatpush3.bf16.msra.mxu1 (!%p189_p3), %v1145_v1 }
   0xd   : > { %1060 = vmatprep.subr.bf16.mxu0 (!%p189_p3), %v1146_v2  ;;  %1106 = vmatprep.subr.bf16.mxu1 (!%p189_p3), %v1146_v2 }
   0xe   : > { %s1371_s18 = smov (!%p230_p4, %s1001_s18), 63 }
   0xf   : > { %s1002_s23 = sshll.u32 %s1371_s18, 2  ;;  %s1004_s12 = sshll.u32 %s1371_s18, 3 }
  0x10   : > { %s1245_s26 = scalar_lea.vmem %s1362_s0, %s1002_s23  ;;  %1061 = vmatpush3.bf16.msra.mxu0 %v1146_v2  ;;  %1114 = vmatpush3.bf16.msra.mxu1 %v1146_v2  ;;  %s1289_s19 = scalar_lea.vmem %s1365_s3, %s1004_s12 }
  0x11   : > { %v1152_v4 = vld [vmem:[%s1245_s26] sm:$0xff]   ;;  %1062 = vmatprep.subr.bf16.mxu0 %v1147_v3  ;;  %1107 = vmatprep.subr.bf16.mxu1 %v1147_v3  ;;  %v1154_v10 = vld [vmem:[%s1245_s26 + $0x8] sm:$0xff]   ;;  %v1156_v12 = vld [vmem:[%s1245_s26 + $0x10] sm:$0xff]  }
  0x12   : > { %v1153_v5 = vld [vmem:[%s1245_s26 + $0x40] sm:$0xff]   ;;  %1072 = vmatprep.mubr.bf16.mxu0 %v1152_v4  ;;  %v1155_v11 = vld [vmem:[%s1245_s26 + $0x48] sm:$0xff]   ;;  %v1157_v13 = vld [vmem:[%s1245_s26 + $0x50] sm:$0xff]  }
  0x13   : > { %1088 = vmatprep.mubr.bf16.mxu1 %v1153_v5  ;;  %v1158_v14 = vld [vmem:[%s1245_s26 + $0x18] sm:$0xff]   ;;  %v1160_v16 = vld [vmem:[%s1245_s26 + $0x20] sm:$0xff]   ;;  %v1162_v18 = vld [vmem:[%s1245_s26 + $0x28] sm:$0xff]  }
  0x14   : > { %1063 = vmatpush3.bf16.msra.mxu0 %v1147_v3  ;;  %1115 = vmatpush3.bf16.msra.mxu1 %v1147_v3  ;;  %v1159_v15 = vld [vmem:[%s1245_s26 + $0x58] sm:$0xff]   ;;  %v1161_v17 = vld [vmem:[%s1245_s26 + $0x60] sm:$0xff]   ;;  %v1163_v19 = vld [vmem:[%s1245_s26 + $0x68] sm:$0xff]  }
  0x15   : > { %1064 = vmatprep.subr.bf16.mxu0 %v1148_v6  ;;  %1108 = vmatprep.subr.bf16.mxu1 %v1148_v6  ;;  %v1164_v20 = vld [vmem:[%s1245_s26 + $0x30] sm:$0xff]   ;;  %v1166_v22 = vld [vmem:[%s1245_s26 + $0x38] sm:$0xff]  }
  0x16   : > { %v1165_v21 = vld [vmem:[%s1245_s26 + $0x70] sm:$0xff]   ;;  %v1167_v23 = vld [vmem:[%s1245_s26 + $0x78] sm:$0xff]  }
  0x18   : > { %1065 = vmatpush3.bf16.msra.mxu0 %v1148_v6  ;;  %1116 = vmatpush3.bf16.msra.mxu1 %v1148_v6 }
  0x19   : > { %1066 = vmatprep.subr.bf16.mxu0 %v1149_v7  ;;  %1109 = vmatprep.subr.bf16.mxu1 %v1149_v7 }
  0x1c   : > { %1067 = vmatpush3.bf16.msra.mxu0 %v1149_v7  ;;  %1117 = vmatpush3.bf16.msra.mxu1 %v1149_v7 }
  0x1d   : > { %1068 = vmatprep.subr.bf16.mxu0 %v1150_v8  ;;  %1110 = vmatprep.subr.bf16.mxu1 %v1150_v8 }
  0x20   : > { %1069 = vmatpush3.bf16.msra.mxu0 %v1150_v8  ;;  %1118 = vmatpush3.bf16.msra.mxu1 %v1150_v8 }
  0x21   : > { %1070 = vmatprep.subr.bf16.mxu0 %v1151_v9  ;;  %1111 = vmatprep.subr.bf16.mxu1 %v1151_v9 }
  0x24   : > { %1071 = vmatpush3.bf16.msra.mxu0 %v1151_v9  ;;  %1119 = vmatpush3.bf16.msra.mxu1 %v1151_v9 }
  0x27   : > { %1073 = vmatmul.mubr.bf16.vlgmr.msra.gmra.mrb[0].mxu0 %v1154_v10  ;;  %1089 = vmatmul.mubr.bf16.vlgmr.msra.gmra.mrb[0].mxu1 %v1155_v11 }
  0x28   : > { %1076 = vmatprep.mubr.bf16.mxu0 %v1156_v12  ;;  %1092 = vmatprep.mubr.bf16.mxu1 %v1157_v13 }
  0x2f   : > { %1077 = vmatmul.mubr.bf16.gmra.mrb[4].mxu0 %v1158_v14  ;;  %1093 = vmatmul.mubr.bf16.gmra.mrb[4].mxu1 %v1159_v15 }
  0x30   : > { %1080 = vmatprep.mubr.bf16.mxu0 %v1160_v16  ;;  %1096 = vmatprep.mubr.bf16.mxu1 %v1161_v17 }
  0x37   : > { %1081 = vmatmul.mubr.bf16.gmra.mrb[8].mxu0 %v1162_v18  ;;  %1097 = vmatmul.mubr.bf16.gmra.mrb[8].mxu1 %v1163_v19 }
  0x38   : > { %1084 = vmatprep.mubr.bf16.mxu0 %v1164_v20  ;;  %1100 = vmatprep.mubr.bf16.mxu1 %v1165_v21 }
  0x3f   : > { %1085 = vmatmul.mubr.bf16.gmra.mrb[12].mxu0 %v1166_v22  ;;  %1101 = vmatmul.mubr.bf16.gmra.mrb[12].mxu1 %v1167_v23 }
  0xfa   : > { %v1074_v25 = vpop.f32.mrb[0].mxu0  ;;  %v1090_v26 = vpop.f32.mrb[0].mxu1 }
  0xfb   : > { %v789_v27 = vadd.f32 %v1074_v25, %v1281_v24  ;;  %v805_v28 = vadd.f32 %v1090_v26, %v1281_v24  ;;  %v554_v29 = vpop.f32.mrb[1].mxu0  ;;  %v618_v30 = vpop.f32.mrb[1].mxu1 }
  0xfc   : > { %v787_v31 = vadd.f32 %v1281_v24, %v554_v29  ;;  %v803_v32 = vadd.f32 %v1281_v24, %v618_v30  ;;  %v1075_v33 = vpop.f32.mrb[2].mxu0  ;;  %v1091_v34 = vpop.f32.mrb[2].mxu1 }
  0xfd   : > { %v821_v35 = vmax.f32 %v789_v27, 0.0  ;;  %v837_v36 = vmax.f32 %v805_v28, 0.0  ;;  %v790_v37 = vadd.f32 %v1075_v33, %v1281_v24  ;;  %v806_v38 = vadd.f32 %v1091_v34, %v1281_v24  ;;  %v557_v39 = vpop.f32.mrb[3].mxu0  ;;  %v621_v40 = vpop.f32.mrb[3].mxu1 }
  0xfe   : > { %v819_v41 = vmax.f32 %v787_v31, 0.0  ;;  %v835_v42 = vmax.f32 %v803_v32, 0.0  ;;  %v788_v43 = vadd.f32 %v1281_v24, %v557_v39  ;;  %v804_v44 = vadd.f32 %v1281_v24, %v621_v40 }
  0xff   : > { %853 = vst [vmem:[%s1289_s19 + $0x10] sm:$0xff] %v821_v35  ;;  %869 = vst [vmem:[%s1289_s19 + $0x90] sm:$0xff] %v837_v36  ;;  %v822_v45 = vmax.f32 %v790_v37, 0.0  ;;  %v838_v46 = vmax.f32 %v806_v38, 0.0 }
 0x100   : > { %851 = vst [vmem:[%s1289_s19] sm:$0xff] %v819_v41  ;;  %867 = vst [vmem:[%s1289_s19 + $0x80] sm:$0xff] %v835_v42  ;;  %v820_v47 = vmax.f32 %v788_v43, 0.0  ;;  %v836_v48 = vmax.f32 %v804_v44, 0.0 }
 0x101   : > { %854 = vst [vmem:[%s1289_s19 + $0x18] sm:$0xff] %v822_v45  ;;  %870 = vst [vmem:[%s1289_s19 + $0x98] sm:$0xff] %v838_v46 }
 0x102   : > { %852 = vst [vmem:[%s1289_s19 + $0x8] sm:$0xff] %v820_v47  ;;  %868 = vst [vmem:[%s1289_s19 + $0x88] sm:$0xff] %v836_v48  ;;  %v1078_v49 = vpop.f32.mrb[4].mxu0  ;;  %v1094_v50 = vpop.f32.mrb[4].mxu1 }
 0x103   : > { %v793_v51 = vadd.f32 %v1078_v49, %v1281_v24  ;;  %v809_v52 = vadd.f32 %v1094_v50, %v1281_v24  ;;  %v570_v53 = vpop.f32.mrb[5].mxu0  ;;  %v634_v54 = vpop.f32.mrb[5].mxu1 }
 0x104   : > { %v791_v55 = vadd.f32 %v1281_v24, %v570_v53  ;;  %v807_v56 = vadd.f32 %v1281_v24, %v634_v54  ;;  %v1079_v57 = vpop.f32.mrb[6].mxu0  ;;  %v1095_v58 = vpop.f32.mrb[6].mxu1 }
 0x105   : > { %v825_v59 = vmax.f32 %v793_v51, 0.0  ;;  %v841_v60 = vmax.f32 %v809_v52, 0.0  ;;  %v794_v61 = vadd.f32 %v1079_v57, %v1281_v24  ;;  %v810_v62 = vadd.f32 %v1095_v58, %v1281_v24  ;;  %v573_v63 = vpop.f32.mrb[7].mxu0  ;;  %v637_v0 = vpop.f32.mrb[7].mxu1 }
 0x106   : > { %v823_v1 = vmax.f32 %v791_v55, 0.0  ;;  %v839_v2 = vmax.f32 %v807_v56, 0.0  ;;  %v792_v3 = vadd.f32 %v1281_v24, %v573_v63  ;;  %v808_v4 = vadd.f32 %v1281_v24, %v637_v0 }
 0x107   : > { %857 = vst [vmem:[%s1289_s19 + $0x30] sm:$0xff] %v825_v59  ;;  %873 = vst [vmem:[%s1289_s19 + $0xb0] sm:$0xff] %v841_v60  ;;  %v826_v5 = vmax.f32 %v794_v61, 0.0  ;;  %v842_v6 = vmax.f32 %v810_v62, 0.0 }
 0x108   : > { %855 = vst [vmem:[%s1289_s19 + $0x20] sm:$0xff] %v823_v1  ;;  %871 = vst [vmem:[%s1289_s19 + $0xa0] sm:$0xff] %v839_v2  ;;  %v824_v7 = vmax.f32 %v792_v3, 0.0  ;;  %v840_v8 = vmax.f32 %v808_v4, 0.0 }
 0x109   : > { %858 = vst [vmem:[%s1289_s19 + $0x38] sm:$0xff] %v826_v5  ;;  %874 = vst [vmem:[%s1289_s19 + $0xb8] sm:$0xff] %v842_v6 }
 0x10a   : > { %856 = vst [vmem:[%s1289_s19 + $0x28] sm:$0xff] %v824_v7  ;;  %872 = vst [vmem:[%s1289_s19 + $0xa8] sm:$0xff] %v840_v8  ;;  %v1082_v9 = vpop.f32.mrb[8].mxu0  ;;  %v1098_v10 = vpop.f32.mrb[8].mxu1 }
 0x10b   : > { %v797_v11 = vadd.f32 %v1082_v9, %v1281_v24  ;;  %v813_v12 = vadd.f32 %v1098_v10, %v1281_v24  ;;  %v586_v13 = vpop.f32.mrb[9].mxu0  ;;  %v650_v14 = vpop.f32.mrb[9].mxu1 }
 0x10c   : > { %v795_v15 = vadd.f32 %v1281_v24, %v586_v13  ;;  %v811_v16 = vadd.f32 %v1281_v24, %v650_v14  ;;  %v1083_v17 = vpop.f32.mrb[10].mxu0  ;;  %v1099_v18 = vpop.f32.mrb[10].mxu1 }
 0x10d   : > { %v829_v19 = vmax.f32 %v797_v11, 0.0  ;;  %v845_v20 = vmax.f32 %v813_v12, 0.0  ;;  %v798_v21 = vadd.f32 %v1083_v17, %v1281_v24  ;;  %v814_v22 = vadd.f32 %v1099_v18, %v1281_v24  ;;  %v589_v23 = vpop.f32.mrb[11].mxu0  ;;  %v653_v25 = vpop.f32.mrb[11].mxu1 }
 0x10e   : > { %v827_v26 = vmax.f32 %v795_v15, 0.0  ;;  %v843_v27 = vmax.f32 %v811_v16, 0.0  ;;  %v796_v28 = vadd.f32 %v1281_v24, %v589_v23  ;;  %v812_v29 = vadd.f32 %v1281_v24, %v653_v25 }
 0x10f   : > { %861 = vst [vmem:[%s1289_s19 + $0x50] sm:$0xff] %v829_v19  ;;  %877 = vst [vmem:[%s1289_s19 + $0xd0] sm:$0xff] %v845_v20  ;;  %v830_v30 = vmax.f32 %v798_v21, 0.0  ;;  %v846_v31 = vmax.f32 %v814_v22, 0.0 }
 0x110   : > { %859 = vst [vmem:[%s1289_s19 + $0x40] sm:$0xff] %v827_v26  ;;  %875 = vst [vmem:[%s1289_s19 + $0xc0] sm:$0xff] %v843_v27  ;;  %v828_v32 = vmax.f32 %v796_v28, 0.0  ;;  %v844_v33 = vmax.f32 %v812_v29, 0.0 }
 0x111   : > { %862 = vst [vmem:[%s1289_s19 + $0x58] sm:$0xff] %v830_v30  ;;  %878 = vst [vmem:[%s1289_s19 + $0xd8] sm:$0xff] %v846_v31 }
 0x112   : > { %860 = vst [vmem:[%s1289_s19 + $0x48] sm:$0xff] %v828_v32  ;;  %876 = vst [vmem:[%s1289_s19 + $0xc8] sm:$0xff] %v844_v33  ;;  %v1086_v34 = vpop.f32.mrb[12].mxu0  ;;  %v1102_v35 = vpop.f32.mrb[12].mxu1 }
 0x113   : > { %v801_v36 = vadd.f32 %v1086_v34, %v1281_v24  ;;  %v817_v37 = vadd.f32 %v1102_v35, %v1281_v24  ;;  %v602_v38 = vpop.f32.mrb[13].mxu0  ;;  %v666_v39 = vpop.f32.mrb[13].mxu1 }
 0x114   : > { %v799_v40 = vadd.f32 %v1281_v24, %v602_v38  ;;  %v815_v41 = vadd.f32 %v1281_v24, %v666_v39  ;;  %v1087_v42 = vpop.f32.mrb[14].mxu0  ;;  %v1103_v43 = vpop.f32.mrb[14].mxu1 }
 0x115   : > { %v833_v44 = vmax.f32 %v801_v36, 0.0  ;;  %v849_v45 = vmax.f32 %v817_v37, 0.0  ;;  %v802_v46 = vadd.f32 %v1087_v42, %v1281_v24  ;;  %v818_v47 = vadd.f32 %v1103_v43, %v1281_v24  ;;  %v605_v48 = vpop.f32.mrb[15].mxu0  ;;  %v669_v49 = vpop.f32.mrb[15].mxu1 }
 0x116   : > { %v831_v50 = vmax.f32 %v799_v40, 0.0  ;;  %v847_v51 = vmax.f32 %v815_v41, 0.0  ;;  %v800_v52 = vadd.f32 %v1281_v24, %v605_v48  ;;  %v816_v53 = vadd.f32 %v1281_v24, %v669_v49 }
 0x117   : > { %865 = vst [vmem:[%s1289_s19 + $0x70] sm:$0xff] %v833_v44  ;;  %881 = vst [vmem:[%s1289_s19 + $0xf0] sm:$0xff] %v849_v45  ;;  %v834_v54 = vmax.f32 %v802_v46, 0.0  ;;  %v850_v55 = vmax.f32 %v818_v47, 0.0 }
 0x118   : > { %863 = vst [vmem:[%s1289_s19 + $0x60] sm:$0xff] %v831_v50  ;;  %879 = vst [vmem:[%s1289_s19 + $0xe0] sm:$0xff] %v847_v51  ;;  %v832_v56 = vmax.f32 %v800_v52, 0.0  ;;  %v848_v57 = vmax.f32 %v816_v53, 0.0 }
 0x119   : > { %866 = vst [vmem:[%s1289_s19 + $0x78] sm:$0xff] %v834_v54  ;;  %882 = vst [vmem:[%s1289_s19 + $0xf8] sm:$0xff] %v850_v55 }
 0x11a   : > { %864 = vst [vmem:[%s1289_s19 + $0x68] sm:$0xff] %v832_v56  ;;  %880 = vst [vmem:[%s1289_s19 + $0xe8] sm:$0xff] %v848_v57 }
 0x11b PF: > { %s13_s14 = sadd.s32 1, %s1190_s14   ;;  %s1366_s12 = smov %s1186_s13 }
 0x11c   : > { %p10_p5 = scmp.ge.s32.totalorder %s13_s14, 4   ;;  %s1367_s13 = smov %s1369_s15 }
 0x11e   :  { %12 = sbr.rel (!%p10_p5) target bundleno = 2 (0x2), region = 76 }

// kernel: _lambda_.6
= control target key start
LH: loop header
LB: loop body
LE: loop exit
PB: predicated region body
PF: predicated region fallthrough
CT: control target
= control target key end

     0   :  { %s602_s1 = inlined_call_operand.vmem [shape: bf16[128,128], index: 1, kind: input, shape index: {}]   ;;  %s603_s0 = inlined_call_operand.vmem [shape: bf16[128,128], index: 0, kind: input, shape index: {}]   ;;  %s604_s2 = inlined_call_operand.vmem [shape: f32[1,128], index: 2, kind: input, shape index: {}]   ;;  %s605_s3 = inlined_call_operand.vmem [shape: f32[128,128], index: 3, kind: output, shape index: {}]  }
   0x1   :  { %v467_v0 = vld [vmem:[%s602_s1] sm:$0xff]   ;;  %v468_v1 = vld [vmem:[%s602_s1 + $0x8] sm:$0xff]   ;;  %v469_v2 = vld [vmem:[%s602_s1 + $0x10] sm:$0xff]  }
   0x2   :  { %419 = vmatprep.subr.bf16.mxu0 %v467_v0  ;;  %451 = vmatprep.subr.bf16.mxu1 %v467_v0  ;;  %v470_v3 = vld [vmem:[%s602_s1 + $0x18] sm:$0xff]   ;;  %v475_v4 = vld [vmem:[%s603_s0] sm:$0xff]   ;;  %v472_v7 = vld [vmem:[%s602_s1 + $0x28] sm:$0xff]  }
   0x3   :  { %420 = vmatpush3.bf16.msra.mxu0 %v467_v0  ;;  %459 = vmatpush3.bf16.msra.mxu1 %v467_v0  ;;  %v476_v5 = vld [vmem:[%s603_s0 + $0x20] sm:$0xff]   ;;  %v473_v8 = vld [vmem:[%s602_s1 + $0x30] sm:$0xff]   ;;  %v474_v9 = vld [vmem:[%s602_s1 + $0x38] sm:$0xff]  }
   0x4   :  { %421 = vmatprep.subr.bf16.mxu0 %v468_v1  ;;  %452 = vmatprep.subr.bf16.mxu1 %v468_v1  ;;  %v471_v6 = vld [vmem:[%s602_s1 + $0x20] sm:$0xff]   ;;  %v477_v10 = vld [vmem:[%s603_s0 + $0x8] sm:$0xff]   ;;  %v479_v12 = vld [vmem:[%s603_s0 + $0x10] sm:$0xff]  }
   0x5   :  { %435 = vmatprep.mubr.bf16.mxu0 %v475_v4  ;;  %443 = vmatprep.mubr.bf16.mxu1 %v476_v5  ;;  %v478_v11 = vld [vmem:[%s603_s0 + $0x28] sm:$0xff]   ;;  %v480_v13 = vld [vmem:[%s603_s0 + $0x30] sm:$0xff]   ;;  %v481_v14 = vld [vmem:[%s603_s0 + $0x18] sm:$0xff]  }
   0x6   :  { %v482_v15 = vld [vmem:[%s603_s0 + $0x38] sm:$0xff]   ;;  %v402_v16 = vld [vmem:[%s604_s2] ss:$0 sm:$0xff] }
   0x7   :  { %422 = vmatpush3.bf16.msra.mxu0 %v468_v1  ;;  %460 = vmatpush3.bf16.msra.mxu1 %v468_v1 }
   0x8   :  { %423 = vmatprep.subr.bf16.mxu0 %v469_v2  ;;  %453 = vmatprep.subr.bf16.mxu1 %v469_v2 }
   0xb   :  { %424 = vmatpush3.bf16.msra.mxu0 %v469_v2  ;;  %461 = vmatpush3.bf16.msra.mxu1 %v469_v2 }
   0xc   :  { %425 = vmatprep.subr.bf16.mxu0 %v470_v3  ;;  %454 = vmatprep.subr.bf16.mxu1 %v470_v3 }
   0xf   :  { %426 = vmatpush3.bf16.msra.mxu0 %v470_v3  ;;  %462 = vmatpush3.bf16.msra.mxu1 %v470_v3 }
  0x10   :  { %427 = vmatprep.subr.bf16.mxu0 %v471_v6  ;;  %455 = vmatprep.subr.bf16.mxu1 %v471_v6 }
  0x13   :  { %428 = vmatpush3.bf16.msra.mxu0 %v471_v6  ;;  %463 = vmatpush3.bf16.msra.mxu1 %v471_v6 }
  0x14   :  { %429 = vmatprep.subr.bf16.mxu0 %v472_v7  ;;  %456 = vmatprep.subr.bf16.mxu1 %v472_v7 }
  0x17   :  { %430 = vmatpush3.bf16.msra.mxu0 %v472_v7  ;;  %464 = vmatpush3.bf16.msra.mxu1 %v472_v7 }
  0x18   :  { %431 = vmatprep.subr.bf16.mxu0 %v473_v8  ;;  %457 = vmatprep.subr.bf16.mxu1 %v473_v8 }
  0x1b   :  { %432 = vmatpush3.bf16.msra.mxu0 %v473_v8  ;;  %465 = vmatpush3.bf16.msra.mxu1 %v473_v8 }
  0x1c   :  { %433 = vmatprep.subr.bf16.mxu0 %v474_v9  ;;  %458 = vmatprep.subr.bf16.mxu1 %v474_v9 }
  0x1f   :  { %434 = vmatpush3.bf16.msra.mxu0 %v474_v9  ;;  %466 = vmatpush3.bf16.msra.mxu1 %v474_v9 }
  0x22   :  { %436 = vmatmul.mubr.bf16.vlgmr.msra.gmra.mrb[0].mxu0 %v477_v10  ;;  %444 = vmatmul.mubr.bf16.vlgmr.msra.gmra.mrb[0].mxu1 %v478_v11 }
  0x23   :  { %439 = vmatprep.mubr.bf16.mxu0 %v479_v12  ;;  %447 = vmatprep.mubr.bf16.mxu1 %v480_v13 }
  0x2a   :  { %440 = vmatmul.mubr.bf16.gmra.mrb[4].mxu0 %v481_v14  ;;  %448 = vmatmul.mubr.bf16.gmra.mrb[4].mxu1 %v482_v15 }
  0xf5   :  { %v437_v17 = vpop.f32.mrb[0].mxu0  ;;  %v445_v18 = vpop.f32.mrb[0].mxu1 }
  0xf6   :  { %v336_v19 = vadd.f32 %v437_v17, %v402_v16  ;;  %v344_v20 = vadd.f32 %v445_v18, %v402_v16  ;;  %v213_v21 = vpop.f32.mrb[1].mxu0  ;;  %v245_v22 = vpop.f32.mrb[1].mxu1 }
  0xf7   :  { %v334_v23 = vadd.f32 %v402_v16, %v213_v21  ;;  %v342_v24 = vadd.f32 %v402_v16, %v245_v22  ;;  %v438_v25 = vpop.f32.mrb[2].mxu0  ;;  %v446_v26 = vpop.f32.mrb[2].mxu1 }
  0xf8   :  { %v352_v27 = vmax.f32 %v336_v19, 0.0  ;;  %v360_v28 = vmax.f32 %v344_v20, 0.0  ;;  %v337_v29 = vadd.f32 %v438_v25, %v402_v16  ;;  %v345_v30 = vadd.f32 %v446_v26, %v402_v16  ;;  %v216_v31 = vpop.f32.mrb[3].mxu0  ;;  %v248_v32 = vpop.f32.mrb[3].mxu1 }
  0xf9   :  { %v350_v33 = vmax.f32 %v334_v23, 0.0  ;;  %v358_v34 = vmax.f32 %v342_v24, 0.0  ;;  %v335_v35 = vadd.f32 %v402_v16, %v216_v31  ;;  %v343_v36 = vadd.f32 %v402_v16, %v248_v32 }
  0xfa   :  { %368 = vst [vmem:[%s605_s3 + $0x10] sm:$0xff] %v352_v27  ;;  %376 = vst [vmem:[%s605_s3 + $0x50] sm:$0xff] %v360_v28  ;;  %v353_v37 = vmax.f32 %v337_v29, 0.0  ;;  %v361_v38 = vmax.f32 %v345_v30, 0.0 }
  0xfb   :  { %366 = vst [vmem:[%s605_s3] sm:$0xff] %v350_v33  ;;  %374 = vst [vmem:[%s605_s3 + $0x40] sm:$0xff] %v358_v34  ;;  %v351_v39 = vmax.f32 %v335_v35, 0.0  ;;  %v359_v40 = vmax.f32 %v343_v36, 0.0 }
  0xfc   :  { %369 = vst [vmem:[%s605_s3 + $0x18] sm:$0xff] %v353_v37  ;;  %377 = vst [vmem:[%s605_s3 + $0x58] sm:$0xff] %v361_v38 }
  0xfd   :  { %367 = vst [vmem:[%s605_s3 + $0x8] sm:$0xff] %v351_v39  ;;  %375 = vst [vmem:[%s605_s3 + $0x48] sm:$0xff] %v359_v40  ;;  %v441_v41 = vpop.f32.mrb[4].mxu0  ;;  %v449_v42 = vpop.f32.mrb[4].mxu1 }
  0xfe   :  { %v340_v43 = vadd.f32 %v441_v41, %v402_v16  ;;  %v348_v44 = vadd.f32 %v449_v42, %v402_v16  ;;  %v229_v45 = vpop.f32.mrb[5].mxu0  ;;  %v261_v46 = vpop.f32.mrb[5].mxu1 }
  0xff   :  { %v338_v47 = vadd.f32 %v402_v16, %v229_v45  ;;  %v346_v48 = vadd.f32 %v402_v16, %v261_v46  ;;  %v442_v49 = vpop.f32.mrb[6].mxu0  ;;  %v450_v50 = vpop.f32.mrb[6].mxu1 }
 0x100   :  { %v356_v51 = vmax.f32 %v340_v43, 0.0  ;;  %v364_v52 = vmax.f32 %v348_v44, 0.0  ;;  %v341_v53 = vadd.f32 %v442_v49, %v402_v16  ;;  %v349_v54 = vadd.f32 %v450_v50, %v402_v16  ;;  %v232_v55 = vpop.f32.mrb[7].mxu0  ;;  %v264_v56 = vpop.f32.mrb[7].mxu1 }
 0x101   :  { %v354_v57 = vmax.f32 %v338_v47, 0.0  ;;  %v362_v58 = vmax.f32 %v346_v48, 0.0  ;;  %v339_v59 = vadd.f32 %v402_v16, %v232_v55  ;;  %v347_v60 = vadd.f32 %v402_v16, %v264_v56 }
 0x102   :  { %372 = vst [vmem:[%s605_s3 + $0x30] sm:$0xff] %v356_v51  ;;  %380 = vst [vmem:[%s605_s3 + $0x70] sm:$0xff] %v364_v52  ;;  %v357_v61 = vmax.f32 %v341_v53, 0.0  ;;  %v365_v62 = vmax.f32 %v349_v54, 0.0 }
 0x103   :  { %370 = vst [vmem:[%s605_s3 + $0x20] sm:$0xff] %v354_v57  ;;  %378 = vst [vmem:[%s605_s3 + $0x60] sm:$0xff] %v362_v58  ;;  %v355_v63 = vmax.f32 %v339_v59, 0.0  ;;  %v363_v0 = vmax.f32 %v347_v60, 0.0 }
 0x104   :  { %373 = vst [vmem:[%s605_s3 + $0x38] sm:$0xff] %v357_v61  ;;  %381 = vst [vmem:[%s605_s3 + $0x78] sm:$0xff] %v365_v62 }
 0x105   :  { %371 = vst [vmem:[%s605_s3 + $0x28] sm:$0xff] %v355_v63  ;;  %379 = vst [vmem:[%s605_s3 + $0x68] sm:$0xff] %v363_v0 }

// kernel: _lambda_.9
= control target key start
LH: loop header
LB: loop body
LE: loop exit
PB: predicated region body
PF: predicated region fallthrough
CT: control target
= control target key end

     0   :  { %v841_v39 = vmov 0.0   ;;  %vm842_vm0 = vmmov 0   ;;  %s1063_s1 = inlined_call_operand.vmem [shape: bf16[512,128], index: 1, kind: input, shape index: {}]   ;;  %s1064_s0 = inlined_call_operand.vmem [shape: bf16[8,512], index: 0, kind: input, shape index: {}]   ;;  %s1065_s3 = inlined_call_operand.vmem [shape: bf16[128,128], index: 3, kind: input, shape index: {}]   ;;  %s1066_s5 = inlined_call_operand.vmem [shape: bf16[128,128], index: 5, kind: input, shape index: {}]   ;;  %s1067_s2 = inlined_call_operand.vmem [shape: f32[1,128], index: 2, kind: input, shape index: {}, may-alias: {2,4}]   ;;  %s1068_s4 = inlined_call_operand.vmem [shape: f32[1,128], index: 4, kind: input, shape index: {}, may-alias: {2,4}]   ;;  %s1069_s6 = inlined_call_operand.vmem [shape: f32[1,128], index: 6, kind: input, shape index: {}]   ;;  %s1070_s7 = inlined_call_operand.vmem [shape: f32[8,128], index: 7, kind: output, shape index: {}]  }
   0x1   :  { %v789_v0 = vld [vmem:[%s1063_s1 + $0x40] sm:$0xff]   ;;  %v793_v4 = vld [vmem:[%s1063_s1 + $0x48] sm:$0xff]   ;;  %v797_v8 = vld [vmem:[%s1063_s1 + $0x50] sm:$0xff]  }
   0x2   :  { %v790_v1 = vld [vmem:[%s1063_s1 + $0xc0] sm:$0xff]   ;;  %685 = vmatprep.subr.bf16.mxu0 %v789_v0  ;;  %v794_v5 = vld [vmem:[%s1063_s1 + $0xc8] sm:$0xff]   ;;  %v798_v9 = vld [vmem:[%s1063_s1 + $0xd0] sm:$0xff]  }
   0x3   :  { %v791_v2 = vld [vmem:[%s1063_s1] sm:$0xff]   ;;  %707 = vmatprep.subr.bf16.mxu1 %v790_v1  ;;  %v795_v6 = vld [vmem:[%s1063_s1 + $0x8] sm:$0xff]   ;;  %v799_v10 = vld [vmem:[%s1063_s1 + $0x10] sm:$0xff]  }
   0x4   :  { %v792_v3 = vld [vmem:[%s1063_s1 + $0x80] sm:$0xff]   ;;  %686 = vmatpush3.bf16.msra.mxu0 %v791_v2  ;;  %v796_v7 = vld [vmem:[%s1063_s1 + $0x88] sm:$0xff]   ;;  %v800_v11 = vld [vmem:[%s1063_s1 + $0x90] sm:$0xff]  }
   0x5   :  { %708 = vmatpush3.bf16.msra.mxu1 %v792_v3  ;;  %687 = vmatprep.subr.bf16.mxu0 %v793_v4  ;;  %v801_v12 = vld [vmem:[%s1063_s1 + $0x58] sm:$0xff]   ;;  %v805_v16 = vld [vmem:[%s1063_s1 + $0x60] sm:$0xff]   ;;  %v809_v20 = vld [vmem:[%s1063_s1 + $0x68] sm:$0xff]  }
   0x6   :  { %709 = vmatprep.subr.bf16.mxu1 %v794_v5  ;;  %v802_v13 = vld [vmem:[%s1063_s1 + $0xd8] sm:$0xff]   ;;  %v806_v17 = vld [vmem:[%s1063_s1 + $0xe0] sm:$0xff]   ;;  %v810_v21 = vld [vmem:[%s1063_s1 + $0xe8] sm:$0xff]  }
   0x7   :  { %v803_v14 = vld [vmem:[%s1063_s1 + $0x18] sm:$0xff]   ;;  %v807_v18 = vld [vmem:[%s1063_s1 + $0x20] sm:$0xff]   ;;  %v811_v22 = vld [vmem:[%s1063_s1 + $0x28] sm:$0xff]  }
   0x8   :  { %688 = vmatpush3.bf16.msra.mxu0 %v795_v6  ;;  %v804_v15 = vld [vmem:[%s1063_s1 + $0x98] sm:$0xff]   ;;  %v808_v19 = vld [vmem:[%s1063_s1 + $0xa0] sm:$0xff]   ;;  %v812_v23 = vld [vmem:[%s1063_s1 + $0xa8] sm:$0xff]  }
   0x9   :  { %710 = vmatpush3.bf16.msra.mxu1 %v796_v7  ;;  %689 = vmatprep.subr.bf16.mxu0 %v797_v8  ;;  %v813_v24 = vld [vmem:[%s1063_s1 + $0x70] sm:$0xff]   ;;  %v817_v28 = vld [vmem:[%s1063_s1 + $0x78] sm:$0xff]   ;;  %v33_v32 = vld [vmem:[%s1064_s0] sm:$0xff] }
   0xa   :  { %711 = vmatprep.subr.bf16.mxu1 %v798_v9  ;;  %v814_v25 = vld [vmem:[%s1063_s1 + $0xf0] sm:$0xff]   ;;  %v818_v29 = vld [vmem:[%s1063_s1 + $0xf8] sm:$0xff]   ;;  %v34_v33 = vld [vmem:[%s1064_s0 + $0x8] sm:$0xff]  ;;  %v630_v34 = vcombine.low %v33_v32, %v33_v32  ;;  %v631_v35 = vcombine.high %v33_v32, %v33_v32 }
   0xb   :  { %v815_v26 = vld [vmem:[%s1063_s1 + $0x30] sm:$0xff]   ;;  %v819_v30 = vld [vmem:[%s1063_s1 + $0x38] sm:$0xff]   ;;  %v632_v36 = vcombine.low %v34_v33, %v34_v33  ;;  %v633_v37 = vcombine.high %v34_v33, %v34_v33  ;;  %v825_v38 = vld [vmem:[%s1065_s3] sm:$0xff]  }
   0xc   :  { %690 = vmatpush3.bf16.msra.mxu0 %v799_v10  ;;  %v816_v27 = vld [vmem:[%s1063_s1 + $0xb0] sm:$0xff]   ;;  %v820_v31 = vld [vmem:[%s1063_s1 + $0xb8] sm:$0xff]   ;;  %337 = vmatprep.mubr.bf16.mxu0 %v631_v35  ;;  %v826_v40 = vld [vmem:[%s1065_s3 + $0x8] sm:$0xff]  }
   0xd   :  { %712 = vmatpush3.bf16.msra.mxu1 %v800_v11  ;;  %691 = vmatprep.subr.bf16.mxu0 %v801_v12  ;;  %v827_v41 = vld [vmem:[%s1065_s3 + $0x10] sm:$0xff]   ;;  %v828_v42 = vld [vmem:[%s1065_s3 + $0x18] sm:$0xff]   ;;  %v829_v43 = vld [vmem:[%s1065_s3 + $0x20] sm:$0xff]  }
   0xe   :  { %713 = vmatprep.subr.bf16.mxu1 %v802_v13  ;;  %377 = vmatprep.mubr.bf16.mxu1 %v633_v37  ;;  %v830_v44 = vld [vmem:[%s1065_s3 + $0x28] sm:$0xff]   ;;  %v831_v45 = vld [vmem:[%s1065_s3 + $0x30] sm:$0xff]   ;;  %v832_v46 = vld [vmem:[%s1065_s3 + $0x38] sm:$0xff]  }
   0xf   :  { %v833_v47 = vld [vmem:[%s1066_s5] sm:$0xff]   ;;  %v834_v48 = vld [vmem:[%s1066_s5 + $0x8] sm:$0xff]   ;;  %v835_v49 = vld [vmem:[%s1066_s5 + $0x10] sm:$0xff]  }
  0x10   :  { %692 = vmatpush3.bf16.msra.mxu0 %v803_v14  ;;  %v836_v50 = vld [vmem:[%s1066_s5 + $0x18] sm:$0xff]   ;;  %v837_v51 = vld [vmem:[%s1066_s5 + $0x20] sm:$0xff]   ;;  %v838_v52 = vld [vmem:[%s1066_s5 + $0x28] sm:$0xff]  }
  0x11   :  { %714 = vmatpush3.bf16.msra.mxu1 %v804_v15  ;;  %693 = vmatprep.subr.bf16.mxu0 %v805_v16  ;;  %v666_v61 = vld [vmem:[%s1067_s2] ss:$0 sm:$0xff]  ;;  %v839_v4 = vld [vmem:[%s1066_s5 + $0x30] sm:$0xff]   ;;  %v840_v5 = vld [vmem:[%s1066_s5 + $0x38] sm:$0xff]  }
  0x12   :  { %715 = vmatprep.subr.bf16.mxu1 %v806_v17  ;;  %v667_v6 = vld [vmem:[%s1068_s4] ss:$0 sm:$0xff] }
  0x13   :  { %v676_v14 = vld [vmem:[%s1069_s6] ss:$0 sm:$0xff] }
  0x14   :  { %694 = vmatpush3.bf16.msra.mxu0 %v807_v18 }
  0x15   :  { %716 = vmatpush3.bf16.msra.mxu1 %v808_v19  ;;  %695 = vmatprep.subr.bf16.mxu0 %v809_v20 }
  0x16   :  { %717 = vmatprep.subr.bf16.mxu1 %v810_v21 }
  0x18   :  { %696 = vmatpush3.bf16.msra.mxu0 %v811_v22 }
  0x19   :  { %718 = vmatpush3.bf16.msra.mxu1 %v812_v23  ;;  %697 = vmatprep.subr.bf16.mxu0 %v813_v24 }
  0x1a   :  { %719 = vmatprep.subr.bf16.mxu1 %v814_v25 }
  0x1c   :  { %698 = vmatpush3.bf16.msra.mxu0 %v815_v26 }
  0x1d   :  { %720 = vmatpush3.bf16.msra.mxu1 %v816_v27  ;;  %699 = vmatprep.subr.bf16.mxu0 %v817_v28 }
  0x1e   :  { %721 = vmatprep.subr.bf16.mxu1 %v818_v29 }
  0x20   :  { %700 = vmatpush3.bf16.msra.mxu0 %v819_v30 }
  0x21   :  { %722 = vmatpush3.bf16.msra.mxu1 %v820_v31  ;;  %747 = vmatprep.subr.bf16.mxu0 %v841_v39 }
  0x22   :  { %767 = vmatprep.subr.bf16.mxu1 %v841_v39 }
  0x23   :  { %338 = vmatmul.mubr.bf16.vlgmr.msra.gmra.mrb[0].mxu0 %v630_v34 }
  0x24   :  { %378 = vmatmul.mubr.bf16.vlgmr.msra.gmra.mrb[0].mxu1 %v632_v36  ;;  %748 = vmatpush3.bf16.msra.mxu0 %v825_v38 }
  0x25   :  { %749 = vmatprep.subr.bf16.mxu0 %v841_v39  ;;  %763 = vmatprep.mubr.msk.bf16.mxu0 %vm842_vm0, %v841_v39 }
  0x26   :  { %783 = vmatprep.mubr.msk.bf16.mxu1 %vm842_vm0, %v841_v39  ;;  %768 = vmatpush3.bf16.msra.mxu1 %v833_v47 }
  0x27   :  { %769 = vmatprep.subr.bf16.mxu1 %v841_v39 }
  0x28   :  { %750 = vmatpush3.bf16.msra.mxu0 %v826_v40 }
  0x29   :  { %751 = vmatprep.subr.bf16.mxu0 %v841_v39 }
  0x2a   :  { %770 = vmatpush3.bf16.msra.mxu1 %v834_v48 }
  0x2b   :  { %771 = vmatprep.subr.bf16.mxu1 %v841_v39 }
  0x2c   :  { %752 = vmatpush3.bf16.msra.mxu0 %v827_v41 }
  0x2d   :  { %753 = vmatprep.subr.bf16.mxu0 %v841_v39 }
  0x2e   :  { %772 = vmatpush3.bf16.msra.mxu1 %v835_v49 }
  0x2f   :  { %773 = vmatprep.subr.bf16.mxu1 %v841_v39 }
  0x30   :  { %754 = vmatpush3.bf16.msra.mxu0 %v828_v42 }
  0x31   :  { %755 = vmatprep.subr.bf16.mxu0 %v841_v39 }
  0x32   :  { %774 = vmatpush3.bf16.msra.mxu1 %v836_v50 }
  0x33   :  { %775 = vmatprep.subr.bf16.mxu1 %v841_v39 }
  0x34   :  { %756 = vmatpush3.bf16.msra.mxu0 %v829_v43 }
  0x35   :  { %757 = vmatprep.subr.bf16.mxu0 %v841_v39 }
  0x36   :  { %776 = vmatpush3.bf16.msra.mxu1 %v837_v51 }
  0x37   :  { %777 = vmatprep.subr.bf16.mxu1 %v841_v39 }
  0x38   :  { %758 = vmatpush3.bf16.msra.mxu0 %v830_v44 }
  0x39   :  { %759 = vmatprep.subr.bf16.mxu0 %v841_v39 }
  0x3a   :  { %778 = vmatpush3.bf16.msra.mxu1 %v838_v52 }
  0x3b   :  { %779 = vmatprep.subr.bf16.mxu1 %v841_v39 }
  0x3c   :  { %760 = vmatpush3.bf16.msra.mxu0 %v831_v45 }
  0x3d   :  { %761 = vmatprep.subr.bf16.mxu0 %v841_v39 }
  0x3e   :  { %780 = vmatpush3.bf16.msra.mxu1 %v839_v4 }
  0x3f   :  { %781 = vmatprep.subr.bf16.mxu1 %v841_v39 }
  0x40   :  { %762 = vmatpush3.bf16.msra.mxu0 %v832_v46 }
  0x42   :  { %782 = vmatpush3.bf16.msra.mxu1 %v840_v5 }
  0xf6   :  { %v701_v53 = vpop.f32.mrb[0].mxu0 }
  0xf7   :  { %v723_v54 = vpop.f32.mrb[0].mxu1  ;;  %v702_v55 = vpop.f32.mrb[1].mxu0 }
  0xf8   :  { %v724_v56 = vpop.f32.mrb[1].mxu1  ;;  %v703_v57 = vadd.f32 %v702_v55, %v701_v53  ;;  %v704_v59 = vpop.f32.mrb[2].mxu0 }
  0xf9   :  { %v725_v58 = vadd.f32 %v724_v56, %v723_v54  ;;  %v726_v60 = vpop.f32.mrb[2].mxu1  ;;  %v705_v62 = vpop.f32.mrb[3].mxu0 }
  0xfa   :  { %v727_v63 = vpop.f32.mrb[3].mxu1 }
  0xfb   :  { %v380_v0 = vadd.f32 %v725_v58, %v703_v57 }
  0xfd   :  { %v398_v1 = vadd.f32 %v666_v61, %v380_v0 }
  0xff   :  { %v399_v2 = vmax.f32 %v398_v1, 0.0 }
 0x101   :  { %v400_v3 = vpack.c.bf16 %v399_v2, %v399_v2 }
 0x103   :  { %764 = vmatmul.mubr.bf16.vlgmr.msra.gmra.mrb[4].mxu0 %v400_v3 }
 0x1d6   :  { %v506_v7 = vpop.f32.mrb[4].mxu0 }
 0x1d7   :  { %v507_v8 = vadd.f32 %v667_v6, %v506_v7  ;;  %v765_v9 = vpop.f32.mrb[5].mxu0 }
 0x1d8   :  { %v509_v10 = vpop.f32.mrb[6].mxu0 }
 0x1d9   :  { %v512_v11 = vmax.f32 %v507_v8, 0.0  ;;  %v766_v12 = vpop.f32.mrb[7].mxu0 }
 0x1db   :  { %v513_v13 = vpack.c.bf16 %v512_v11, %v512_v11 }
 0x1dd   :  { %784 = vmatmul.mubr.bf16.vlgmr.msra.gmra.mrb[4].mxu1 %v513_v13 }
 0x2b0   :  { %v619_v15 = vpop.f32.mrb[4].mxu1 }
 0x2b1   :  { %v620_v16 = vadd.f32 %v676_v14, %v619_v15  ;;  %v785_v17 = vpop.f32.mrb[5].mxu1 }
 0x2b2   :  { %v622_v18 = vpop.f32.mrb[6].mxu1 }
 0x2b3   :  { %625 = vst [vmem:[%s1070_s7] sm:$0xff] %v620_v16  ;;  %v786_v19 = vpop.f32.mrb[7].mxu1 }

</bundles_post_ra>
